<compile_context>
chip_gen: v6e
topology: v6e:2x2x1
jax: 0.10.0
libtpu: 0.0.40
codegen_flags: <defaults>
</compile_context>

<pallas_src>
import functools

import jax
import jax.numpy as jnp
from jax import lax
from jax.experimental import pallas as pl
from jax.experimental.pallas import tpu as pltpu


def _smoothness_kernel(x_ref, o_ref, acc_v_ref, acc_h_ref, *,
                       B, H, W, S, use_roll, inv_count):
    s = pl.program_id(1)

    @pl.when(s == 0)
    def _init():
        acc_v_ref[...] = jnp.zeros_like(acc_v_ref)
        acc_h_ref[...] = jnp.zeros_like(acc_h_ref)

    # Stream in native dtype; upcast in VMEM (no-op for f32 inputs).
    xs = x_ref[...].astype(jnp.float32)                           # (B, H, W)

    # ---- vertical term: sublane (row) shifts via lane-aligned slices --------
    vert = 2.0 * xs[:, 1:-1, :] - xs[:, :-2, :] - xs[:, 2:, :]    # (B, H-2, W)
    col = lax.broadcasted_iota(jnp.int32, (B, H - 2, W), 2)
    v_abs = jnp.where((col > 0) & (col < W - 1), jnp.abs(vert), 0.0)
    v_part = jnp.sum(v_abs, axis=0)                               # (H-2, W)
    acc_v_ref[...] += jnp.sum(v_part, axis=0, keepdims=True)      # (1, W)

    # ---- horizontal term ----------------------------------------------------
    if use_roll:
        # Lane-axis rotations on the XLU instead of misaligned lane slices.
        xs2 = xs.reshape(B * H, W)          # no-op: H % 8 == 0, W % 128 == 0
        left = pltpu.roll(xs2, shift=1, axis=1)       # x[..., j-1] (wraps at 0)
        right = pltpu.roll(xs2, shift=W - 1, axis=1)  # x[..., j+1] (wraps at W-1)
        horiz = (2.0 * xs2 - left - right).reshape(B, H, W)
        row = lax.broadcasted_iota(jnp.int32, (B, H, W), 1)
        colf = lax.broadcasted_iota(jnp.int32, (B, H, W), 2)
        interior = (row > 0) & (row < H - 1) & (colf > 0) & (colf < W - 1)
        # Zero wrapped-around / boundary entries before summing.
        h_abs = jnp.where(interior, jnp.abs(horiz), 0.0)          # (B, H, W)
    else:
        # W not lane-aligned: interior-slice formulation.
        horiz = (2.0 * xs[:, 1:-1, 1:-1]
                 - xs[:, 1:-1, :-2] - xs[:, 1:-1, 2:])            # (B, H-2, W-2)
        h_abs = jnp.abs(horiz)
    h_part = jnp.sum(h_abs, axis=0)
    acc_h_ref[...] += jnp.sum(h_part, axis=0, keepdims=True)      # (1, W) or (1, W-2)

    @pl.when(s == S - 1)
    def _finalize():
        total = (jnp.sum(acc_v_ref[...], keepdims=True)
                 + jnp.sum(acc_h_ref[...], keepdims=True))        # (1, 1)
        o_ref[...] = total * inv_count


def smoothness_loss(depth: jax.Array, *, target_block_bytes: int = 2 << 20) -> jax.Array:
    """Pallas TPU implementation of SmoothnessLoss.forward(depth)."""
    assert depth.ndim == 4, (
        "expected 4-dimensional data, but instead got {}".format(depth.ndim))
    N, C, H, W = depth.shape
    assert H > 2 and W > 2, "need spatial dims > 2 for second derivatives"

    NC = N * C
    x = depth.reshape(NC, H, W)   # glue reshape in plain JAX

    # B = slices per grid step: largest divisor of NC whose tile stays around
    # `target_block_bytes` (default 2 MiB), so each step is a large,
    # double-bufferable DMA that fits the 32 MiB scoped VMEM default on
    # v5e/v6e/v7x with plenty of headroom.
    slice_bytes = H * W * depth.dtype.itemsize
    b_cap = int(max(1, min(NC, target_block_bytes // max(1, slice_bytes))))
    B = 1
    for d in range(b_cap, 0, -1):
        if NC % d == 0:
            B = d
            break
    steps = NC // B

    # Split the step sequence over two parallel grid slots when possible
    # (maps onto both v7x TensorCores; harmless on single-core chips).
    P = 2 if (steps >= 2 and steps % 2 == 0) else 1
    S = steps // P

    use_roll = (W % 128 == 0) and (H % 8 == 0)
    Wh = W if use_roll else W - 2
    inv_count = 1.0 / float(NC * (H - 2) * (W - 2))

    kernel = functools.partial(
        _smoothness_kernel, B=B, H=H, W=W, S=S,
        use_roll=use_roll, inv_count=inv_count)

    partials = pl.pallas_call(
        kernel,
        out_shape=jax.ShapeDtypeStruct((P, 1), jnp.float32),
        grid_spec=pltpu.PrefetchScalarGridSpec(
            num_scalar_prefetch=0,
            grid=(P, S),
            in_specs=[pl.BlockSpec((B, H, W), lambda p, s: (p * S + s, 0, 0))],
            out_specs=pl.BlockSpec((1, 1), lambda p, s: (p, 0)),
            scratch_shapes=[pltpu.VMEM((1, W), jnp.float32),
                            pltpu.VMEM((1, Wh), jnp.float32)],
        ),
        compiler_params=pltpu.CompilerParams(
            dimension_semantics=("parallel", "arbitrary")),
    )(x)

    # Tiny (P, 1) partial combine stays in plain JAX.
    return jnp.sum(partials)


def smoothness_loss_ref(depth: jax.Array) -> jax.Array:
    """Plain-JAX reference mirroring the PyTorch forward."""
    x = depth.astype(jnp.float32)
    horizontal = 2 * x[:, :, 1:-1, 1:-1] - x[:, :, 1:-1, :-2] - x[:, :, 1:-1, 2:]
    vertical = 2 * x[:, :, 1:-1, 1:-1] - x[:, :, :-2, 1:-1] - x[:, :, 2:, 1:-1]
    return (jnp.abs(horizontal) + jnp.abs(vertical)).mean()


if __name__ == "__main__":
    key = jax.random.PRNGKey(0)
    k1, k2 = jax.random.split(key)

    # Test 1: module-consistent small shape; exercises the interior-slice
    # fallback path (W = 16 is not lane-aligned) with a single batched step.
    depth = jax.random.normal(k1, (2, 4, 16, 16), dtype=jnp.float32)
    loss = jax.block_until_ready(smoothness_loss(depth))
    ref = smoothness_loss_ref(depth)
    assert jnp.allclose(loss, ref, rtol=5e-5, atol=1e-6), (loss, ref)

    # Test 2: lane-aligned shape; exercises the pltpu.roll path, multi-step
    # accumulation and the 2-way parallel grid split (small block size forced
    # via target_block_bytes so the grid has several steps).
    depth2 = jax.random.normal(k2, (2, 2, 8, 128), dtype=jnp.float32)
    loss2 = jax.block_until_ready(
        smoothness_loss(depth2, target_block_bytes=4096))
    ref2 = smoothness_loss_ref(depth2)
    assert jnp.allclose(loss2, ref2, rtol=5e-5, atol=1e-6), (loss2, ref2)

    print("KERNEL_OK")
</pallas_src>

<mosaic_0001>
module attributes {stable_mosaic.version = 11 : i64} {
  func.func @_smoothness_kernel(%arg0: i32, %arg1: i32, %arg2: memref<8x16x16xf32, #tpu.memory_space<vmem>>, %arg3: memref<1x1xf32, #tpu.memory_space<vmem>>, %arg4: memref<1x16xf32, #tpu.memory_space<vmem>>, %arg5: memref<1x14xf32, #tpu.memory_space<vmem>>) attributes {dimension_semantics = [#tpu.dimension_semantics<parallel>, #tpu.dimension_semantics<arbitrary>], iteration_bounds = array<i64: 1, 1>, scalar_prefetch = 0 : i64, scratch_operands = 2 : i64, tpu.core_type = #tpu.core_type<tc>, window_params = [{transform_indices = @transform_0, window_bounds = array<i64: 8, 16, 16>}, {transform_indices = @transform_1, window_bounds = array<i64: 1, 1>}]} {
    %c0_i32 = arith.constant 0 : i32
    %0 = arith.cmpi eq, %arg1, %c0_i32 : i32
    %1 = arith.extui %0 : i1 to i32
    %c0_i32_0 = arith.constant 0 : i32
    %2 = arith.cmpi ne, %1, %c0_i32_0 : i32
    scf.if %2 {
      %cst_20 = arith.constant 0.000000e+00 : f32
      %43 = vector.broadcast %cst_20 : f32 to vector<1x16xf32>
      %c0_21 = arith.constant 0 : index
      %c0_22 = arith.constant 0 : index
      %44 = vector.load %arg4[%c0_21, %c0_22] : memref<1x16xf32, #tpu.memory_space<vmem>>, vector<1x16xf32>
      tpu.vector_store %arg4[%c0_21, %c0_22], %43 {strides = array<i32>} : memref<1x16xf32, #tpu.memory_space<vmem>>, vector<1x16xf32>,
      %cst_23 = arith.constant 0.000000e+00 : f32
      %45 = vector.broadcast %cst_23 : f32 to vector<1x14xf32>
      %c0_24 = arith.constant 0 : index
      %c0_25 = arith.constant 0 : index
      %46 = vector.load %arg5[%c0_24, %c0_25] : memref<1x14xf32, #tpu.memory_space<vmem>>, vector<1x14xf32>
      tpu.vector_store %arg5[%c0_24, %c0_25], %45 {strides = array<i32>} : memref<1x14xf32, #tpu.memory_space<vmem>>, vector<1x14xf32>,
    } else {
    }
    %c0 = arith.constant 0 : index
    %c0_1 = arith.constant 0 : index
    %c0_2 = arith.constant 0 : index
    %3 = vector.load %arg2[%c0, %c0_1, %c0_2] : memref<8x16x16xf32, #tpu.memory_space<vmem>>, vector<8x16x16xf32>
    %4 = vector.extract_strided_slice %3 {offsets = [0, 1, 0], sizes = [8, 14, 16], strides = [1, 1, 1]} : vector<8x16x16xf32> to vector<8x14x16xf32>
    %cst = arith.constant 2.000000e+00 : f32
    %5 = vector.broadcast %cst : f32 to vector<8x14x16xf32>
    %6 = arith.mulf %5, %4 : vector<8x14x16xf32>
    %7 = vector.extract_strided_slice %3 {offsets = [0, 0, 0], sizes = [8, 14, 16], strides = [1, 1, 1]} : vector<8x16x16xf32> to vector<8x14x16xf32>
    %8 = arith.subf %6, %7 : vector<8x14x16xf32>
    %9 = vector.extract_strided_slice %3 {offsets = [0, 2, 0], sizes = [8, 14, 16], strides = [1, 1, 1]} : vector<8x16x16xf32> to vector<8x14x16xf32>
    %10 = arith.subf %8, %9 : vector<8x14x16xf32>
    %11 = tpu.iota {dimensions = array<i32: 2>} : vector<8x14x16xi32>
    %c0_i32_3 = arith.constant 0 : i32
    %12 = vector.broadcast %c0_i32_3 : i32 to vector<8x14x16xi32>
    %13 = arith.cmpi sgt, %11, %12 : vector<8x14x16xi32>
    %c15_i32 = arith.constant 15 : i32
    %14 = vector.broadcast %c15_i32 : i32 to vector<8x14x16xi32>
    %15 = arith.cmpi slt, %11, %14 : vector<8x14x16xi32>
    %16 = arith.andi %13, %15 : vector<8x14x16xi1>
    %17 = math.absf %10 : vector<8x14x16xf32>
    %cst_4 = arith.constant 0.000000e+00 : f32
    %18 = vector.broadcast %cst_4 : f32 to vector<8x14x16xf32>
    %19 = arith.select %16, %17, %18 : vector<8x14x16xi1>, vector<8x14x16xf32>
    %cst_5 = arith.constant dense<0.000000e+00> : vector<14x16xf32>
    %20 = vector.multi_reduction <add>, %19, %cst_5 [0] : vector<8x14x16xf32> to vector<14x16xf32>
    %c0_6 = arith.constant 0 : index
    %c0_7 = arith.constant 0 : index
    %21 = vector.load %arg4[%c0_6, %c0_7] : memref<1x16xf32, #tpu.memory_space<vmem>>, vector<1x16xf32>
    %cst_8 = arith.constant dense<0.000000e+00> : vector<16xf32>
    %22 = vector.multi_reduction <add>, %20, %cst_8 [0] : vector<14x16xf32> to vector<16xf32>
    %23 = vector.shape_cast %22 : vector<16xf32> to vector<1x16xf32>
    %24 = arith.addf %21, %23 : vector<1x16xf32>
    %c0_9 = arith.constant 0 : index
    %c0_10 = arith.constant 0 : index
    %25 = vector.load %arg4[%c0_9, %c0_10] : memref<1x16xf32, #tpu.memory_space<vmem>>, vector<1x16xf32>
    tpu.vector_store %arg4[%c0_9, %c0_10], %24 {strides = array<i32>} : memref<1x16xf32, #tpu.memory_space<vmem>>, vector<1x16xf32>,
    %26 = vector.extract_strided_slice %3 {offsets = [0, 1, 1], sizes = [8, 14, 14], strides = [1, 1, 1]} : vector<8x16x16xf32> to vector<8x14x14xf32>
    %cst_11 = arith.constant 2.000000e+00 : f32
    %27 = vector.broadcast %cst_11 : f32 to vector<8x14x14xf32>
    %28 = arith.mulf %27, %26 : vector<8x14x14xf32>
    %29 = vector.extract_strided_slice %3 {offsets = [0, 1, 0], sizes = [8, 14, 14], strides = [1, 1, 1]} : vector<8x16x16xf32> to vector<8x14x14xf32>
    %30 = arith.subf %28, %29 : vector<8x14x14xf32>
    %31 = vector.extract_strided_slice %3 {offsets = [0, 1, 2], sizes = [8, 14, 14], strides = [1, 1, 1]} : vector<8x16x16xf32> to vector<8x14x14xf32>
    %32 = arith.subf %30, %31 : vector<8x14x14xf32>
    %33 = math.absf %32 : vector<8x14x14xf32>
    %cst_12 = arith.constant dense<0.000000e+00> : vector<14x14xf32>
    %34 = vector.multi_reduction <add>, %33, %cst_12 [0] : vector<8x14x14xf32> to vector<14x14xf32>
    %c0_13 = arith.constant 0 : index
    %c0_14 = arith.constant 0 : index
    %35 = vector.load %arg5[%c0_13, %c0_14] : memref<1x14xf32, #tpu.memory_space<vmem>>, vector<1x14xf32>
    %cst_15 = arith.constant dense<0.000000e+00> : vector<14xf32>
    %36 = vector.multi_reduction <add>, %34, %cst_15 [0] : vector<14x14xf32> to vector<14xf32>
    %37 = vector.shape_cast %36 : vector<14xf32> to vector<1x14xf32>
    %38 = arith.addf %35, %37 : vector<1x14xf32>
    %c0_16 = arith.constant 0 : index
    %c0_17 = arith.constant 0 : index
    %39 = vector.load %arg5[%c0_16, %c0_17] : memref<1x14xf32, #tpu.memory_space<vmem>>, vector<1x14xf32>
    tpu.vector_store %arg5[%c0_16, %c0_17], %38 {strides = array<i32>} : memref<1x14xf32, #tpu.memory_space<vmem>>, vector<1x14xf32>,
    %c0_i32_18 = arith.constant 0 : i32
    %40 = arith.cmpi eq, %arg1, %c0_i32_18 : i32
    %41 = arith.extui %40 : i1 to i32
    %c0_i32_19 = arith.constant 0 : i32
    %42 = arith.cmpi ne, %41, %c0_i32_19 : i32
    scf.if %42 {
      %c0_20 = arith.constant 0 : index
      %c0_21 = arith.constant 0 : index
      %43 = vector.load %arg4[%c0_20, %c0_21] : memref<1x16xf32, #tpu.memory_space<vmem>>, vector<1x16xf32>
      %44 = vector.shape_cast %43 : vector<1x16xf32> to vector<1x1x16xf32>
      %cst_22 = arith.constant dense<0.000000e+00> : vector<1xf32>
      %45 = vector.multi_reduction <add>, %44, %cst_22 [1, 2] : vector<1x1x16xf32> to vector<1xf32>
      %46 = vector.shape_cast %45 : vector<1xf32> to vector<1x1x1xf32>
      %47 = vector.extract %46[0, 0, 0] : f32 from vector<1x1x1xf32>
      %48 = vector.broadcast %47 : f32 to vector<1x1xf32>
      %c0_23 = arith.constant 0 : index
      %c0_24 = arith.constant 0 : index
      %49 = vector.load %arg5[%c0_23, %c0_24] : memref<1x14xf32, #tpu.memory_space<vmem>>, vector<1x14xf32>
      %50 = vector.shape_cast %49 : vector<1x14xf32> to vector<1x1x14xf32>
      %cst_25 = arith.constant dense<0.000000e+00> : vector<1xf32>
      %51 = vector.multi_reduction <add>, %50, %cst_25 [1, 2] : vector<1x1x14xf32> to vector<1xf32>
      %52 = vector.shape_cast %51 : vector<1xf32> to vector<1x1x1xf32>
      %53 = vector.extract %52[0, 0, 0] : f32 from vector<1x1x1xf32>
      %54 = vector.broadcast %53 : f32 to vector<1x1xf32>
      %55 = arith.addf %48, %54 : vector<1x1xf32>
      %cst_26 = arith.constant 6.37755089E-4 : f32
      %56 = vector.broadcast %cst_26 : f32 to vector<1x1xf32>
      %57 = arith.mulf %55, %56 : vector<1x1xf32>
      %c0_27 = arith.constant 0 : index
      %c0_28 = arith.constant 0 : index
      %58 = vector.load %arg3[%c0_27, %c0_28] : memref<1x1xf32, #tpu.memory_space<vmem>>, vector<1x1xf32>
      tpu.vector_store %arg3[%c0_27, %c0_28], %57 {strides = array<i32>} : memref<1x1xf32, #tpu.memory_space<vmem>>, vector<1x1xf32>,
    } else {
    }
    return
  }
  func.func @transform_0(%arg0: i32, %arg1: i32) -> (i32, i32, i32) {
    %c1_i32 = arith.constant 1 : i32
    %0 = arith.muli %arg0, %c1_i32 : i32
    %1 = arith.addi %0, %arg1 : i32
    %c0_i32 = arith.constant 0 : i32
    %c0_i32_0 = arith.constant 0 : i32
    %c0_i32_1 = arith.constant 0 : i32
    return %1, %c0_i32, %c0_i32_0 : i32, i32, i32
  }
  func.func @transform_1(%arg0: i32, %arg1: i32) -> (i32, i32) {
    %c0_i32 = arith.constant 0 : i32
    %c0_i32_0 = arith.constant 0 : i32
    return %arg0, %c0_i32 : i32, i32
  }
}

</mosaic_0001>

<bundles_post_ra>
// kernel: tpu_custom_call.1
= control target key start
LH: loop header
LB: loop body
LE: loop exit
PB: predicated region body
PF: predicated region fallthrough
CT: control target
= control target key end

     0   :  { %6 = vsyncpa [#allocation5], 0  ;;  %s923_s0 = inlined_call_operand.hbm [shape: f32[8,16,16], index: 0, kind: input, shape index: {}]   ;;  %s924_s1 = inlined_call_operand.hbm [shape: f32[1,1], index: 1, kind: output, shape index: {}]  }
   0x1   :  { %7 = vsyncpa [#allocation6], 0  ;;  %s609_s6 = smov [#allocation4]  }
   0x2   :  { %s18_s7 = sshll.u32 %s609_s6, 4  ;;  %s19_s7 = int_to_ptr.vmem [resolvable:$true] %s18_s7 }
   0x3   :  { %s573_s8 = scalar_lea.vmem %s19_s7, 2048  ;;  %p578_p1 = scmp.lt.s32.totalorder %s19_s7, %s19_s7 }
   0x4   :  { %p574_p0 = scmp.ne.s32.totalorder %s19_s7, %s573_s8  ;;  %p579_p2 = scmp.lt.s32.totalorder %s573_s8, %s573_s8 }
   0x6   :  { %p580_p3 = por %p579_p2, %p578_p1 }
   0x8   :  { %p581_p4 = pnand %p580_p3, %p574_p0 }
   0xa   :  { %584 = shalt.err (!%p581_p4)
}
   0xb   :  { %s610_s9 = smov 128   ;;  %s611_s10 = smov 8  }
   0xc   :  { %24 = dma.hbm_to_vmem [thread:$0]  %s923_s0, 2048, %s19_s7, [#allocation5], %s610_s9, %s610_s9, %s611_s10  }
   0xd   :  { %605 = dma.done.wait [#allocation5], 2048  }
   0xe   :  { %606 = vsyncadd [#allocation5], 4294965248  ;;  %v200_v0 = vlaneseq  ;;  %v631_v2 = vld [vmem:[#allocation4 + $0x10] sm:$0xff]  ;;  %v633_v3 = vld [vmem:[#allocation4] sm:$0xff]  ;;  %vm143_vm0 = vcmask 1046528   ;;  %vm237_vm1 = vcmask 130049  }
   0xf   :  { %v635_v4 = vld [vmem:[#allocation4 + $0x18] sm:$0xff]  ;;  %vm86_vm2 = vcmask 1040384   ;;  %s612_s13 = smov 1   ;;  %v39_v5 = vld [vmem:[#allocation4 + $0x8] sm:$0xff]  ;;  %v643_v7 = vmul.f32 2.0, %v631_v2  ;;  %v90_v8 = vrot.slane %v631_v2, 7 }
  0x10   :  { %v201_v1 = vand.u32 127, %v200_v0  ;;  %295 = vrot.lane.b32.xlu1 %v631_v2, %s612_s13  ;;  %291 = vrot.lane.b32.xlu0 %v633_v3, %s612_s13  ;;  %v148_v6 = vrot.slane %v635_v4, 1  ;;  %v147_v9 = vrot.slane %v631_v2, 1  ;;  %v145_v10 = vrot.slane %v39_v5, 1  ;;  %v656_v16 = vld [vmem:[#allocation4 + $0x28] sm:$0xff]  ;;  %v665_v21 = vld [vmem:[#allocation4 + $0x20] sm:$0xff] }
  0x11   :  { %v648_v11 = vmul.f32 2.0, %v633_v3  ;;  %v129_v12 = vsub.f32 %v643_v7, %v90_v8  ;;  %v87_v13 = vrot.slane %v633_v3, 7  ;;  %v144_v14 = vrot.slane %v633_v3, 1  ;;  %v702_v50 = vld [vmem:[#allocation4 + $0x30] sm:$0xff]  ;;  %s613_s0 = smov 127   ;;  %v708_v54 = vld [vmem:[#allocation4 + $0x38] sm:$0xff] }
  0x12   :  { %vm202_vm3 = vcmp.gt.s32.totalorder %v201_v1, 0  ;;  %vm203_vm4 = vcmp.lt.s32.totalorder %v201_v1, 15  ;;  %v654_v15 = vmul.f32 2.0, %v635_v4  ;;  %v149_v17 = vsel %vm143_vm0, %v147_v9, %v148_v6  ;;  %s616_s16 = smov [#allocation7]  }
  0x13   :  { %v91_v18 = vrot.slane %v635_v4, 7  ;;  %v660_v19 = vmul.f32 2.0, %v39_v5  ;;  %v88_v20 = vrot.slane %v39_v5, 7  ;;  %v186_v22 = vsub.f32 %v129_v12, %v149_v17  ;;  %vm674_vm5 = vmand %vm202_vm3, %vm203_vm4  ;;  %s544_s17 = sshll.u32 %s616_s16, 4  ;;  %s545_s17 = int_to_ptr.vmem [resolvable:$true] %s544_s17 }
  0x14   :  { %297 = vrot.lane.b32.xlu1 %v635_v4, %s612_s13  ;;  %293 = vrot.lane.b32.xlu0 %v39_v5, %s612_s13  ;;  %v127_v23 = vsub.f32 %v648_v11, %v87_v13  ;;  %v146_v24 = vsel %vm143_vm0, %v144_v14, %v145_v10  ;;  %v670_v25 = vmul.f32 2.0, %v656_v16  ;;  %v93_v29 = vrot.slane %v665_v21, 7  ;;  %s585_s18 = scalar_lea.vmem %s545_s17, 16  ;;  %s589_s19 = scalar_lea.vmem %s545_s17, 32 }
  0x15   :  { %v92_v27 = vsel %vm86_vm2, %v90_v8, %v91_v18  ;;  %v89_v28 = vsel %vm86_vm2, %v87_v13, %v88_v20  ;;  %v94_v30 = vrot.slane %v656_v16, 7  ;;  %v207_v31 = vand.u32 2147483647, %v186_v22  ;;  %v738_v18 = vld [vmem:[#allocation4 + $0x48] sm:$0xff]  ;;  %v740_v20 = vld [vmem:[#allocation4 + $0x40] sm:$0xff]  ;;  %p586_p5 = scmp.ne.s32.totalorder %s545_s17, %s585_s18  ;;  %p590_p6 = scmp.lt.s32.totalorder %s545_s17, %s545_s17 }
  0x16   :  { %v184_v32 = vsub.f32 %v127_v23, %v146_v24  ;;  %v130_v33 = vsub.f32 %v654_v15, %v92_v27  ;;  %v128_v34 = vsub.f32 %v660_v19, %v89_v28  ;;  %v151_v36 = vrot.slane %v656_v16, 1  ;;  %p591_p7 = scmp.lt.s32.totalorder %s589_s19, %s585_s18 }
  0x17   :  { %v95_v35 = vsel %vm86_vm2, %v93_v29, %v94_v30  ;;  %v687_v37 = vmul.f32 2.0, %v665_v21  ;;  %v150_v38 = vrot.slane %v665_v21, 1  ;;  %v223_v39 = vsel %vm674_vm5, %v207_v31, 0.0 }
  0x18   :  { %301 = vrot.lane.b32.xlu1 %v656_v16, %s612_s13  ;;  %299 = vrot.lane.b32.xlu0 %v665_v21, %s612_s13  ;;  %v205_v40 = vand.u32 2147483647, %v184_v32  ;;  %v187_v41 = vsub.f32 %v130_v33, %v148_v6  ;;  %v185_v42 = vsub.f32 %v128_v34, %v145_v10  ;;  %v239_v43 = vsel %vm237_vm1, %v223_v39, 0.0  ;;  %p592_p8 = por %p591_p7, %p590_p6 }
  0x19   :  { %v132_v44 = vsub.f32 %v670_v25, %v95_v35  ;;  %v131_v45 = vsub.f32 %v687_v37, %v93_v29  ;;  %v152_v46 = vsel %vm143_vm0, %v150_v38, %v151_v36  ;;  %vm253_vm6 = vcmask 129024   ;;  %v761_v38 = vld [vmem:[#allocation4 + $0x50] sm:$0xff] }
  0x1a   :  { %v221_v47 = vsel %vm674_vm5, %v205_v40, 0.0  ;;  %v208_v48 = vand.u32 2147483647, %v187_v41  ;;  %v206_v49 = vand.u32 2147483647, %v185_v42  ;;  %v96_v58 = vrot.slane %v702_v50, 7  ;;  %p593_p9 = pnand %p592_p8, %p586_p5 }
  0x1b   :  { %v238_v51 = vsel %vm237_vm1, %v221_v47, 0.0  ;;  %v189_v52 = vsub.f32 %v132_v44, %v151_v36  ;;  %v188_v53 = vsub.f32 %v131_v45, %v152_v46  ;;  %v97_v1 = vrot.slane %v708_v54, 7  ;;  %v759_v36 = vld [vmem:[#allocation4 + $0x58] sm:$0xff] }
  0x1c   :  { %357 = vrot.lane.b32.xlu1 %v39_v5, %s613_s0  ;;  %355 = vrot.lane.b32.xlu0 %v633_v3, %s613_s0  ;;  %v240_v55 = vadd.f32 %v239_v43, %v238_v51  ;;  %v224_v56 = vsel %vm674_vm5, %v208_v48, 0.0  ;;  %v222_v57 = vsel %vm674_vm5, %v206_v49, 0.0  ;;  %v154_v3 = vrot.slane %v708_v54, 1 }
  0x1d   :  { %v255_v59 = vsel %vm253_vm6, %v224_v56, 0.0  ;;  %v254_v60 = vsel %vm253_vm6, %v222_v57, 0.0  ;;  %v210_v61 = vand.u32 2147483647, %v189_v52  ;;  %v209_v62 = vand.u32 2147483647, %v188_v53 }
  0x1e   :  { %v256_v63 = vadd.f32 %v255_v59, %v254_v60  ;;  %v720_v5 = vmul.f32 2.0, %v702_v50  ;;  %v727_v9 = vmul.f32 2.0, %v708_v54  ;;  %v153_v10 = vrot.slane %v702_v50, 1 }
  0x1f   :  { %v226_v6 = vsel %vm674_vm5, %v210_v61, 0.0  ;;  %v225_v8 = vsel %vm674_vm5, %v209_v62, 0.0  ;;  %v98_v14 = vsel %vm86_vm2, %v96_v58, %v97_v1  ;;  %v100_v28 = vrot.slane %v738_v18, 7 }
  0x20   :  { %361 = vrot.lane.b32.xlu1 %v635_v4, %s613_s0  ;;  %359 = vrot.lane.b32.xlu0 %v631_v2, %s613_s0  ;;  %v257_v12 = vsel %vm253_vm6, %v226_v6, 0.0  ;;  %v241_v13 = vsel %vm237_vm1, %v225_v8, 0.0  ;;  %v133_v17 = vsub.f32 %v720_v5, %v96_v58  ;;  %v134_v24 = vsub.f32 %v727_v9, %v98_v14  ;;  %v800_v14 = vld [vmem:[#allocation4 + $0x60] sm:$0xff] }
  0x21   :  { %v258_v22 = vadd.f32 %v257_v12, %v256_v63  ;;  %v242_v23 = vadd.f32 %v241_v13, %v240_v55  ;;  %v155_v4 = vsel %vm143_vm0, %v153_v10, %v154_v3  ;;  %v99_v2 = vrot.slane %v740_v20, 7 }
  0x22   :  { %v190_v27 = vsub.f32 %v133_v17, %v155_v4  ;;  %v157_v29 = vrot.slane %v738_v18, 1  ;;  %v191_v30 = vsub.f32 %v134_v24, %v154_v3  ;;  %v748_v31 = vmul.f32 2.0, %v738_v18  ;;  %v802_v17 = vld [vmem:[#allocation4 + $0x68] sm:$0xff] }
  0x23   :  { %v751_v32 = vmul.f32 2.0, %v740_v20  ;;  %v156_v33 = vrot.slane %v740_v20, 1  ;;  %v101_v35 = vsel %vm86_vm2, %v99_v2, %v100_v28  ;;  %v769_v44 = vmul.f32 2.0, %v759_v36 }
  0x24   :  { %305 = vrot.lane.b32.xlu1 %v708_v54, %s612_s13  ;;  %303 = vrot.lane.b32.xlu0 %v702_v50, %s612_s13  ;;  %v211_v34 = vand.u32 2147483647, %v190_v27  ;;  %v212_v39 = vand.u32 2147483647, %v191_v30  ;;  %v136_v40 = vsub.f32 %v748_v31, %v101_v35  ;;  %v772_v45 = vmul.f32 2.0, %v761_v38 }
  0x25   :  { %v135_v41 = vsub.f32 %v751_v32, %v99_v2  ;;  %v158_v42 = vsel %vm143_vm0, %v156_v33, %v157_v29  ;;  %v102_v53 = vrot.slane %v761_v38, 7  ;;  %v103_v55 = vrot.slane %v759_v36, 7 }
  0x26   :  { %v227_v43 = vsel %vm674_vm5, %v211_v34, 0.0  ;;  %v228_v46 = vsel %vm674_vm5, %v212_v39, 0.0  ;;  %v193_v48 = vsub.f32 %v136_v40, %v157_v29  ;;  %v160_v59 = vrot.slane %v759_v36, 1 }
  0x27   :  { %v243_v47 = vsel %vm237_vm1, %v227_v43, 0.0  ;;  %v192_v49 = vsub.f32 %v135_v41, %v158_v42  ;;  %v259_v51 = vsel %vm253_vm6, %v228_v46, 0.0  ;;  %v104_v60 = vsel %vm86_vm2, %v102_v53, %v103_v55 }
  0x28   :  { %365 = vrot.lane.b32.xlu1 %v656_v16, %s613_s0  ;;  %363 = vrot.lane.b32.xlu0 %v665_v21, %s613_s0  ;;  %v244_v52 = vadd.f32 %v243_v47, %v242_v23  ;;  %v260_v56 = vadd.f32 %v259_v51, %v258_v22  ;;  %v214_v57 = vand.u32 2147483647, %v193_v48  ;;  %v137_v61 = vsub.f32 %v772_v45, %v102_v53  ;;  %v52_v47 = vld [vmem:[#allocation4 + $0x70] sm:$0xff] }
  0x29   :  { %v213_v58 = vand.u32 2147483647, %v192_v49  ;;  %v159_v16 = vrot.slane %v761_v38, 1  ;;  %v138_v63 = vsub.f32 %v769_v44, %v104_v60  ;;  %v805_v24 = vmul.f32 2.0, %v800_v14  ;;  %v53_v49 = vld [vmem:[#allocation4 + $0x78] sm:$0xff] }
  0x2a   :  { %v230_v21 = vsel %vm674_vm5, %v214_v57, 0.0  ;;  %v105_v4 = vrot.slane %v800_v14, 7  ;;  %v106_v27 = vrot.slane %v802_v17, 7  ;;  %v163_v2 = vrot.slane %v802_v17, 1 }
  0x2b   :  { %v229_v62 = vsel %vm674_vm5, %v213_v58, 0.0  ;;  %v261_v1 = vsel %vm253_vm6, %v230_v21, 0.0  ;;  %v161_v6 = vsel %vm143_vm0, %v159_v16, %v160_v59  ;;  %v195_v12 = vsub.f32 %v138_v63, %v160_v59 }
  0x2c   :  { %309 = vrot.lane.b32.xlu1 %v738_v18, %s612_s13  ;;  %307 = vrot.lane.b32.xlu0 %v740_v20, %s612_s13  ;;  %v245_v3 = vsel %vm237_vm1, %v229_v62, 0.0  ;;  %v262_v8 = vadd.f32 %v261_v1, %v260_v56  ;;  %v194_v13 = vsub.f32 %v137_v61, %v161_v6  ;;  %v162_v28 = vrot.slane %v800_v14, 1 }
  0x2d   :  { %v246_v10 = vadd.f32 %v245_v3, %v244_v52  ;;  %v216_v22 = vand.u32 2147483647, %v195_v12  ;;  %v820_v33 = vmul.f32 2.0, %v802_v17  ;;  %v107_v34 = vsel %vm86_vm2, %v105_v4, %v106_v27 }
  0x2e   :  { %v215_v23 = vand.u32 2147483647, %v194_v13  ;;  %v139_v35 = vsub.f32 %v805_v24, %v105_v4  ;;  %v164_v42 = vsel %vm143_vm0, %v162_v28, %v163_v2  ;;  %v832_v52 = vmul.f32 2.0, %v52_v47 }
  0x2f   :  { %v232_v29 = vsel %vm674_vm5, %v216_v22, 0.0  ;;  %v140_v41 = vsub.f32 %v820_v33, %v107_v34  ;;  %v108_v55 = vrot.slane %v52_v47, 7  ;;  %v109_v56 = vrot.slane %v53_v49, 7 }
  0x30   :  { %369 = vrot.lane.b32.xlu1 %v708_v54, %s613_s0  ;;  %367 = vrot.lane.b32.xlu0 %v702_v50, %s613_s0  ;;  %v231_v30 = vsel %vm674_vm5, %v215_v23, 0.0  ;;  %v263_v54 = vsel %vm253_vm6, %v232_v29, 0.0  ;;  %v196_v43 = vsub.f32 %v139_v35, %v164_v42  ;;  %v166_v57 = vrot.slane %v53_v49, 1 }
  0x31   :  { %v247_v50 = vsel %vm237_vm1, %v231_v30, 0.0  ;;  %v264_v39 = vadd.f32 %v263_v54, %v262_v8  ;;  %v197_v46 = vsub.f32 %v140_v41, %v163_v2  ;;  %v843_v60 = vmul.f32 2.0, %v53_v49 }
  0x32   :  { %v248_v40 = vadd.f32 %v247_v50, %v246_v10  ;;  %v217_v48 = vand.u32 2147483647, %v196_v43  ;;  %v165_v61 = vrot.slane %v52_v47, 1  ;;  %v110_v21 = vsel %vm86_vm2, %v108_v55, %v109_v56 }
  0x33   :  { %v218_v51 = vand.u32 2147483647, %v197_v46  ;;  %v142_v63 = vsub.f32 %v843_v60, %v110_v21  ;;  %vm279_vm7 = vcmask 128000   ;;  %vm277_vm8 = vcmask 130048  }
  0x34   :  { %313 = vrot.lane.b32.xlu1 %v759_v36, %s612_s13  ;;  %311 = vrot.lane.b32.xlu0 %v761_v38, %s612_s13  ;;  %v233_v53 = vsel %vm674_vm5, %v217_v48, 0.0  ;;  %v167_v1 = vsel %vm143_vm0, %v165_v61, %v166_v57  ;;  %vm36_vm9 = vcmask 106496   ;;  %v614_v30 = vmov 0.0  }
  0x35   :  { %v234_v58 = vsel %vm674_vm5, %v218_v51, 0.0  ;;  %v249_v59 = vsel %vm237_vm1, %v233_v53, 0.0  ;;  %v199_v6 = vsub.f32 %v142_v63, %v166_v57  ;;  %37 = vst.msk [vmem:[#allocation3] sm:$0x1] %vm36_vm9, %v614_v30  ;;  %vm451_vm10 = vcmask 120840  }
  0x36   :  { %v265_v16 = vsel %vm253_vm6, %v234_v58, 0.0  ;;  %vm435_vm11 = vcmask 121865   ;;  %vm34_vm12 = vcmask 122880   ;;  %vm477_vm13 = vcmask 119816  }
  0x37   :  { %v266_v62 = vadd.f32 %v265_v16, %v264_v39  ;;  %v220_v10 = vand.u32 2147483647, %v199_v6  ;;  %35 = vst.msk [vmem:[#allocation2] sm:$0x1] %vm34_vm12, %v614_v30  ;;  %vm475_vm14 = vcmask 121864   ;;  %vm536_vm15 = vcmask 0  }
  0x38   :  { %373 = vrot.lane.b32.xlu1 %v738_v18, %s613_s0  ;;  %371 = vrot.lane.b32.xlu0 %v740_v20, %s613_s0  ;;  %v250_v18 = vadd.f32 %v249_v59, %v248_v40  ;;  %v141_v20 = vsub.f32 %v832_v52, %v108_v55 }
  0x39   :  { %v236_v13 = vsel %vm674_vm5, %v220_v10, 0.0 }
  0x3a   :  { %v198_v3 = vsub.f32 %v141_v20, %v167_v1  ;;  %v267_v23 = vsel %vm253_vm6, %v236_v13, 0.0 }
  0x3b   :  { %v268_v27 = vadd.f32 %v267_v23, %v266_v62 }
  0x3c   :  { %317 = vrot.lane.b32.xlu1 %v802_v17, %s612_s13  ;;  %315 = vrot.lane.b32.xlu0 %v800_v14, %s612_s13  ;;  %v219_v8 = vand.u32 2147483647, %v198_v3 }
  0x3d   :  { %v273_v2 = vrot.slane %v268_v27, 1 }
  0x3e   :  { %v235_v12 = vsel %vm674_vm5, %v219_v8, 0.0 }
  0x3f   :  { %v251_v22 = vsel %vm237_vm1, %v235_v12, 0.0 }
  0x40   :  { %377 = vrot.lane.b32.xlu1 %v759_v36, %s613_s0  ;;  %375 = vrot.lane.b32.xlu0 %v761_v38, %s613_s0  ;;  %v252_v4 = vadd.f32 %v251_v22, %v250_v18  ;;  %v280_v38 = vsel %vm279_vm7, %v273_v2, 0.0 }
  0x42   :  { %v272_v36 = vrot.slane %v252_v4, 1 }
  0x44   :  { %321 = vrot.lane.b32.xlu1 %v53_v49, %s612_s13  ;;  %319 = vrot.lane.b32.xlu0 %v52_v47, %s612_s13  ;;  %v274_v28 = vsel %vm143_vm0, %v272_v36, %v273_v2 }
  0x45   :  { %v278_v26 = vsel %vm277_vm8, %v274_v28, 0.0 }
  0x46   :  { %v871_v29 = vadd.f32 %v280_v38, %v278_v26 }
  0x48   :  { %381 = vrot.lane.b32.xlu1 %v802_v17, %s613_s0  ;;  %379 = vrot.lane.b32.xlu0 %v800_v14, %s613_s0 }
  0x4c   :  { %385 = vrot.lane.b32.xlu1 %v53_v49, %s613_s0  ;;  %383 = vrot.lane.b32.xlu0 %v52_v47, %s613_s0 }
  0x82   :  { %v296_v54 = vpop.permute.xlu1 %295  ;;  %v292_v50 = vpop.permute.xlu0 %291 }
  0x83   :  { %v339_v14 = vsub.f32 %v648_v11, %v292_v50  ;;  %v341_v47 = vsub.f32 %v643_v7, %v296_v54 }
  0x86   :  { %v298_v34 = vpop.permute.xlu1 %297  ;;  %v294_v35 = vpop.permute.xlu0 %293 }
  0x87   :  { %v340_v40 = vsub.f32 %v660_v19, %v294_v35  ;;  %v342_v48 = vsub.f32 %v654_v15, %v298_v34 }
  0x8a   :  { %v302_v17 = vpop.permute.xlu1 %301  ;;  %v300_v39 = vpop.permute.xlu0 %299 }
  0x8b   :  { %v344_v20 = vsub.f32 %v670_v25, %v302_v17  ;;  %v343_v62 = vsub.f32 %v687_v37, %v300_v39 }
  0x8e   :  { %v358_v41 = vpop.permute.xlu1 %357  ;;  %v356_v42 = vpop.permute.xlu0 %355 }
  0x8f   :  { %v404_v43 = vsub.f32 %v340_v40, %v358_v41  ;;  %v403_v46 = vsub.f32 %v339_v14, %v356_v42 }
  0x91   :  { %v420_v53 = vand.u32 2147483647, %v404_v43  ;;  %v419_v55 = vand.u32 2147483647, %v403_v46 }
  0x92   :  { %v362_v49 = vpop.permute.xlu1 %361  ;;  %v360_v51 = vpop.permute.xlu0 %359 }
  0x93   :  { %v406_v56 = vsub.f32 %v342_v48, %v362_v49  ;;  %v405_v57 = vsub.f32 %v341_v47, %v360_v51  ;;  %v452_v61 = vsel %vm451_vm10, %v420_v53, 0.0  ;;  %v436_v16 = vsel %vm435_vm11, %v419_v55, 0.0 }
  0x95   :  { %v422_v58 = vand.u32 2147483647, %v406_v56  ;;  %v421_v11 = vand.u32 2147483647, %v405_v57 }
  0x96   :  { %v306_v59 = vpop.permute.xlu1 %305  ;;  %v304_v19 = vpop.permute.xlu0 %303 }
  0x97   :  { %v453_v7 = vsel %vm451_vm10, %v422_v58, 0.0  ;;  %v437_v15 = vsel %vm435_vm11, %v421_v11, 0.0  ;;  %v346_v36 = vsub.f32 %v727_v9, %v306_v59  ;;  %v345_v25 = vsub.f32 %v720_v5, %v304_v19 }
  0x98   :  { %v454_v18 = vadd.f32 %v453_v7, %v452_v61  ;;  %v438_v21 = vadd.f32 %v437_v15, %v436_v16  ;;  %v282_v15 = vrot.slane %v871_v29, 4 }
  0x9a   :  { %v366_v63 = vpop.permute.xlu1 %365  ;;  %v364_v1 = vpop.permute.xlu0 %363 }
  0x9b   :  { %v408_v3 = vsub.f32 %v344_v20, %v366_v63  ;;  %v407_v6 = vsub.f32 %v343_v62, %v364_v1  ;;  %v283_v63 = vadd.f32 %v282_v15, %v871_v29 }
  0x9d   :  { %v424_v8 = vand.u32 2147483647, %v408_v3  ;;  %v423_v10 = vand.u32 2147483647, %v407_v6 }
  0x9e   :  { %v310_v12 = vpop.permute.xlu1 %309  ;;  %v308_v13 = vpop.permute.xlu0 %307 }
  0x9f   :  { %v455_v22 = vsel %vm451_vm10, %v424_v8, 0.0  ;;  %v439_v23 = vsel %vm435_vm11, %v423_v10, 0.0  ;;  %v348_v40 = vsub.f32 %v748_v31, %v310_v12  ;;  %v347_v9 = vsub.f32 %v751_v32, %v308_v13 }
  0xa0   :  { %v456_v4 = vadd.f32 %v455_v22, %v454_v18  ;;  %v440_v27 = vadd.f32 %v439_v23, %v438_v21  ;;  %v284_v23 = vrot.slane %v283_v63, 2 }
  0xa2   :  { %v370_v2 = vpop.permute.xlu1 %369  ;;  %v368_v37 = vpop.permute.xlu0 %367 }
  0xa3   :  { %v410_v38 = vsub.f32 %v346_v36, %v370_v2  ;;  %v409_v28 = vsub.f32 %v345_v25, %v368_v37 }
  0xa5   :  { %v426_v26 = vand.u32 2147483647, %v410_v38  ;;  %v425_v54 = vand.u32 2147483647, %v409_v28  ;;  %v285_v28 = vadd.f32 %v284_v23, %v283_v63 }
  0xa6   :  { %v314_v50 = vpop.permute.xlu1 %313  ;;  %v312_v34 = vpop.permute.xlu0 %311 }
  0xa7   :  { %v457_v35 = vsel %vm451_vm10, %v426_v26, 0.0  ;;  %v441_v17 = vsel %vm435_vm11, %v425_v54, 0.0  ;;  %v350_v57 = vsub.f32 %v769_v44, %v314_v50  ;;  %v349_v31 = vsub.f32 %v772_v45, %v312_v34 }
  0xa8   :  { %v458_v39 = vadd.f32 %v457_v35, %v456_v4  ;;  %v442_v14 = vadd.f32 %v441_v17, %v440_v27  ;;  %v286_v50 = vrot.slane %v285_v28, 1 }
  0xaa   :  { %v374_v41 = vpop.permute.xlu1 %373  ;;  %v372_v5 = vpop.permute.xlu0 %371  ;;  %v287_v17 = vadd.f32 %v286_v50, %v285_v28 }
  0xab   :  { %v412_v42 = vsub.f32 %v348_v40, %v374_v41  ;;  %v411_v43 = vsub.f32 %v347_v9, %v372_v5  ;;  %v269_v40 = vld [vmem:[#allocation2] sm:$0x1] }
  0xac   :  { %v288_v41 = vadd.f32 %v287_v17, %v269_v40 }
  0xad   :  { %v428_v46 = vand.u32 2147483647, %v412_v42  ;;  %v427_v47 = vand.u32 2147483647, %v411_v43  ;;  %v615_v42 = vmov 1966171168  }
  0xae   :  { %v318_v48 = vpop.permute.xlu1 %317  ;;  %v316_v49 = vpop.permute.xlu0 %315  ;;  %290 = vst.msk [vmem:[#allocation2] sm:$0x1] %vm34_vm12, %v288_v41  ;;  %v488_v43 = vunpack.c.l.s4 %v615_v42 }
  0xaf   :  { %v459_v51 = vsel %vm451_vm10, %v428_v46, 0.0  ;;  %v443_v53 = vsel %vm435_vm11, %v427_v47, 0.0  ;;  %v352_v44 = vsub.f32 %v820_v33, %v318_v48  ;;  %v351_v45 = vsub.f32 %v805_v24, %v316_v49 }
  0xb0   :  { %v460_v55 = vadd.f32 %v459_v51, %v458_v39  ;;  %v444_v56 = vadd.f32 %v443_v53, %v442_v14  ;;  %v489_v48 = vunpack.c.0.s8 %v488_v43  ;;  %v491_v49 = vshrl.u32 %v200_v0, 7 }
  0xb2   :  { %v378_v58 = vpop.permute.xlu1 %377  ;;  %v376_v32 = vpop.permute.xlu0 %375 }
  0xb3   :  { %v414_v11 = vsub.f32 %v350_v57, %v378_v58  ;;  %v413_v59 = vsub.f32 %v349_v31, %v376_v32  ;;  %v492_v57 = vsub.s32 %v489_v48, %v491_v49 }
  0xb5   :  { %v430_v19 = vand.u32 2147483647, %v414_v11  ;;  %v429_v61 = vand.u32 2147483647, %v413_v59  ;;  %v510_v53 = vld [vmem:[#allocation2] sm:$0x1] }
  0xb6   :  { %v322_v16 = vpop.permute.xlu1 %321  ;;  %v320_v7 = vpop.permute.xlu0 %319  ;;  %v467_v11 = vld [vmem:[#allocation3] sm:$0x1] }
  0xb7   :  { %v461_v18 = vsel %vm451_vm10, %v430_v19, 0.0  ;;  %v445_v21 = vsel %vm435_vm11, %v429_v61, 0.0  ;;  %v354_v10 = vsub.f32 %v843_v60, %v322_v16  ;;  %v353_v12 = vsub.f32 %v832_v52, %v320_v7 }
  0xb8   :  { %v462_v20 = vadd.f32 %v461_v18, %v460_v55  ;;  %v446_v62 = vadd.f32 %v445_v21, %v444_v56  ;;  %v511_v55 = vsel %vm34_vm12, %v510_v53, 0.0 }
  0xb9   :  { %512 = vadd.xlane.f32.xlu1 %v511_v55 }
  0xba   :  { %v382_v1 = vpop.permute.xlu1 %381  ;;  %v380_v3 = vpop.permute.xlu0 %379 }
  0xbb   :  { %v416_v6 = vsub.f32 %v352_v44, %v382_v1  ;;  %v415_v8 = vsub.f32 %v351_v45, %v380_v3 }
  0xbd   :  { %v432_v13 = vand.u32 2147483647, %v416_v6  ;;  %v431_v22 = vand.u32 2147483647, %v415_v8 }
  0xbe   :  { %v386_v4 = vpop.permute.xlu1 %385  ;;  %v384_v27 = vpop.permute.xlu0 %383 }
  0xbf   :  { %v463_v36 = vsel %vm451_vm10, %v432_v13, 0.0  ;;  %v447_v33 = vsel %vm435_vm11, %v431_v22, 0.0  ;;  %v418_v24 = vsub.f32 %v354_v10, %v386_v4  ;;  %v417_v25 = vsub.f32 %v353_v12, %v384_v27 }
  0xc0   :  { %v464_v29 = vadd.f32 %v463_v36, %v462_v20  ;;  %v448_v2 = vadd.f32 %v447_v33, %v446_v62 }
  0xc1   :  { %v434_v37 = vand.u32 2147483647, %v418_v24  ;;  %v433_v38 = vand.u32 2147483647, %v417_v25 }
  0xc3   :  { %v465_v52 = vsel %vm451_vm10, %v434_v37, 0.0  ;;  %v449_v60 = vsel %vm435_vm11, %v433_v38, 0.0 }
  0xc4   :  { %v466_v26 = vadd.f32 %v465_v52, %v464_v29  ;;  %v450_v54 = vadd.f32 %v449_v60, %v448_v2 }
  0xc6   :  { %v471_v34 = vrot.slane %v466_v26, 1  ;;  %v470_v35 = vrot.slane %v450_v54, 1 }
  0xc8   :  { %v478_v39 = vsel %vm477_vm13, %v471_v34, 0.0  ;;  %v472_v14 = vsel %vm143_vm0, %v470_v35, %v471_v34 }
  0xc9   :  { %v476_v9 = vsel %vm475_vm14, %v472_v14, 0.0 }
  0xca   :  { %v479_v30 = vadd.f32 %v478_v39, %v476_v9 }
  0xcc   :  { %v480_v5 = vrot.slane %v479_v30, 4 }
  0xce   :  { %v481_v46 = vadd.f32 %v480_v5, %v479_v30 }
  0xd0   :  { %v482_v47 = vrot.slane %v481_v46, 2 }
  0xd2   :  { %v483_v51 = vadd.f32 %v482_v47, %v481_v46 }
  0xd4   :  { %v484_v56 = vrot.slane %v483_v51, 1 }
  0xd6   :  { %v485_v31 = vadd.f32 %v484_v56, %v483_v51 }
  0xd8   :  { %v493_v58 = vrot.slane %v485_v31, %v492_v57 }
  0xda   :  { %v500_v32 = vrot.slane %v493_v58, %v492_v57 }
  0xdc   :  { %501 = vrot.lane.b32.xlu0 %v500_v32, %s613_s0 }
 0x142   :  { %v513_v16 = vpop.xlane.xlu1 %512 }
 0x143   :  { %v514_v7 = vrot.slane %v513_v16, 4 }
 0x145   :  { %v515_v15 = vadd.f32 %v514_v7, %v513_v16 }
 0x147   :  { %v516_v18 = vrot.slane %v515_v15, 2 }
 0x149   :  { %v517_v21 = vadd.f32 %v516_v18, %v515_v15 }
 0x14b   :  { %v518_v20 = vrot.slane %v517_v21, 1 }
 0x14d   :  { %v519_v62 = vadd.f32 %v518_v20, %v517_v21 }
 0x14e   :  { %v502_v59 = vpop.permute.xlu0 %501 }
 0x14f   :  { %v504_v19 = vadd.f32 %v502_v59, %v467_v11  ;;  %553 = vpush %v519_v62 }
 0x151   :  { %506 = vst.msk [vmem:[#allocation3] sm:$0x1] %vm36_vm9, %v504_v19 }
 0x158   :  { %v522_v61 = vld [vmem:[#allocation3] sm:$0x1] }
 0x159   :  { %v523_v0 = vsel %vm36_vm9, %v522_v61, 0.0 }
 0x15a   :  { %524 = vadd.xlane.f32.xlu0 %v523_v0 }
 0x180   :  { %s554_s14 = spop %553 }
 0x181   :  { %v521_v10 = vstv %s554_s14 }
 0x1e3   :  { %v525_v44 = vpop.xlane.xlu0 %524 }
 0x1e4   :  { %v526_v45 = vrot.slane %v525_v44, 4 }
 0x1e6   :  { %v527_v63 = vadd.f32 %v526_v45, %v525_v44 }
 0x1e8   :  { %v528_v1 = vrot.slane %v527_v63, 2 }
 0x1ea   :  { %v529_v3 = vadd.f32 %v528_v1, %v527_v63 }
 0x1ec   :  { %v530_v6 = vrot.slane %v529_v3, 1 }
 0x1ee   :  { %v531_v8 = vadd.f32 %v530_v6, %v529_v3 }
 0x1f0   :  { %555 = vpush %v531_v8 }
 0x221   :  { %s556_s15 = spop %555 }
 0x222   :  { %v533_v12 = vstv %s556_s15 }
 0x223   :  { %v534_v13 = vadd.f32 %v533_v12, %v521_v10 }
 0x225   :  { %v535_v22 = vmul.f32 0.0006377551, %v534_v13 }
 0x227   :  { %537 = vst.msk [vmem:[#allocation7] sm:$0x1] %vm536_vm15, %v535_v22 }
 0x228   :  { %596 = shalt.err (!%p593_p9)
}
 0x229   :  { %547 = dma.vmem_to_hbm [thread:$0]  %s545_s17, 16, %s924_s1, [#allocation6]  }
 0x22a   :  { %607 = dma.done.wait [#allocation6], 16  }
 0x22b   :  { %608 = vsyncadd [#allocation6], 4294967280 }
 0x22c   :  { %551 = vsyncpa [#allocation5], 1 }
 0x22d   :  { %552 = vsyncpa [#allocation6], 1 }

</bundles_post_ra>
